<compile_context>
chip_gen: v5e
topology: v5e:2x2
jax: 0.10.0
libtpu: 0.0.40
codegen_flags: <defaults>
</compile_context>

<pallas_src>
import math

import jax
import jax.numpy as jnp
from jax.experimental import pallas as pl
from jax.experimental.pallas import tpu as pltpu


_TM_DEFAULT = 512                 # adjacency row tile (output rows)
_TK_DEFAULT = 1024                # adjacency contraction tile


def _vmem_budget():
    """Per-generation scoped-VMEM budget (leave headroom for compiler scratch)."""
    try:
        cap = int(pltpu.get_tpu_info().vmem_capacity_bytes)
    except Exception:
        cap = 64 * 1024 * 1024
    return max(min(cap - 16 * 1024 * 1024, 96 * 1024 * 1024), 32 * 1024 * 1024)


_VMEM_LIMIT = _vmem_budget()


# ----------------------------------------------------------------------------
# Helpers.
# ----------------------------------------------------------------------------
def _round_up(x, m):
    return ((x + m - 1) // m) * m


def _pad2(a, rows, cols):
    return jnp.pad(a, ((0, rows - a.shape[0]), (0, cols - a.shape[1])))


def _divisor_tile(n_pad, cap, quantum):
    """Largest divisor of n_pad that is <= cap and a multiple of `quantum`."""
    best = None
    d = quantum
    limit = min(cap, n_pad)
    while d <= limit:
        if n_pad % d == 0:
            best = d
        d += quantum
    return best if best is not None else n_pad


def _choose_tiles(n):
    """Pick (tm, tk, n_pad): lane-dense padding, >=2 row tiles when possible."""
    n_pad = max(_round_up(n, 128), 128)
    # Row tile: large for DMA efficiency but capped at n_pad//2 so the
    # "parallel" axis has >= 2 entries (v7x has 2 TensorCores per chip).
    tm = _divisor_tile(n_pad, min(_TM_DEFAULT, max(n_pad // 2, 64)), 64)
    tk = _divisor_tile(n_pad, _TK_DEFAULT, 128)
    return tm, tk, n_pad


def _adj_storage(adj_pad_f32):
    """Store adjacency as int8 when exactly binary (common GCN case), else bf16.

    Either way the dominant HBM stream is 1-2 B/element instead of 4 B; the
    upcast to bf16 happens on idle VPU slots inside the (HBM-bound) kernels.
    """
    try:
        is_binary = bool(jnp.all((adj_pad_f32 == 0.0) | (adj_pad_f32 == 1.0)))
    except Exception:            # traced (e.g. under jit): fall back to bf16
        is_binary = False
    if is_binary:
        return adj_pad_f32.astype(jnp.int8)
    return adj_pad_f32.astype(jnp.bfloat16)


def _to_bf16_operand(a):
    if a.dtype == jnp.bfloat16:
        return a
    return a.astype(jnp.float32).astype(jnp.bfloat16)


# ----------------------------------------------------------------------------
# Kernels.
# ----------------------------------------------------------------------------
def _transform_kernel(scale_ref, x_ref, w_ref, s_ref):
    """S = (inv_col * X) @ W1, kept in f32 (consumed VMEM-resident downstream)."""
    x = (x_ref[...].astype(jnp.float32) * scale_ref[...]).astype(jnp.bfloat16)
    s_ref[...] = jnp.dot(x, w_ref[...], preferred_element_type=jnp.float32)


def _prop_mid_kernel(adj_ref, s_ref, inv_row_ref, inv_col_ref, w_ref,
                     t_ref, acc_ref):
    """acc += A_tile @ S[k-slice]; finalize: T = (inv_col*relu(inv_row*acc)) @ Wcat.

    S is VMEM-resident (constant block index); the adjacency tile arrives as
    int8/bf16 and is upcast to bf16 right before the MXU.
    """
    k = pl.program_id(1)
    tk = adj_ref.shape[1]

    @pl.when(k == 0)
    def _():
        acc_ref[...] = jnp.zeros_like(acc_ref)

    a = _to_bf16_operand(adj_ref[...])
    off = pl.multiple_of(k * tk, 128)
    s = s_ref[pl.ds(off, tk), :].astype(jnp.bfloat16)
    acc_ref[...] += jnp.dot(a, s, preferred_element_type=jnp.float32)

    @pl.when(k == pl.num_programs(1) - 1)
    def _():
        h = jnp.maximum(acc_ref[...] * inv_row_ref[...], 0.0)   # relu(gc1)
        h = (h * inv_col_ref[...]).astype(jnp.bfloat16)         # pre-scale pass 2
        t_ref[...] = jnp.dot(h, w_ref[...], preferred_element_type=jnp.float32)


def _prop_out_kernel(adj_ref, t_ref, inv_row_ref, z_ref, acc_ref):
    """acc += A_tile @ T[k-slice]; finalize: Z = inv_row * acc.  T is resident."""
    k = pl.program_id(1)
    tk = adj_ref.shape[1]

    @pl.when(k == 0)
    def _():
        acc_ref[...] = jnp.zeros_like(acc_ref)

    a = _to_bf16_operand(adj_ref[...])
    off = pl.multiple_of(k * tk, 128)
    t = t_ref[pl.ds(off, tk), :].astype(jnp.bfloat16)
    acc_ref[...] += jnp.dot(a, t, preferred_element_type=jnp.float32)

    @pl.when(k == pl.num_programs(1) - 1)
    def _():
        z_ref[...] = acc_ref[...] * inv_row_ref[...]


def _identity_encode_kernel(x_ref, w1_ref, wcat_ref, z_ref):
    """adj == I path: Z = relu(X @ W1) @ Wcat (no adjacency matmul at all)."""
    h = jnp.maximum(jnp.dot(x_ref[...], w1_ref[...],
                            preferred_element_type=jnp.float32), 0.0)
    z_ref[...] = jnp.dot(h.astype(jnp.bfloat16), wcat_ref[...],
                         preferred_element_type=jnp.float32)


# ----------------------------------------------------------------------------
# pallas_call wrappers.
# ----------------------------------------------------------------------------
def _transform(x_bf16, scale, w_bf16, tm):
    n_pad, f_pad = x_bf16.shape
    hid_pad = w_bf16.shape[1]
    return pl.pallas_call(
        _transform_kernel,
        grid=(n_pad // tm,),
        in_specs=[pl.BlockSpec((tm, 1), lambda i: (i, 0)),
                  pl.BlockSpec((tm, f_pad), lambda i: (i, 0)),
                  pl.BlockSpec((f_pad, hid_pad), lambda i: (0, 0))],
        out_specs=pl.BlockSpec((tm, hid_pad), lambda i: (i, 0)),
        out_shape=jax.ShapeDtypeStruct((n_pad, hid_pad), jnp.float32),
        compiler_params=pltpu.CompilerParams(
            dimension_semantics=("parallel",),
            vmem_limit_bytes=_VMEM_LIMIT),
    )(scale, x_bf16, w_bf16)


def _propagate_mid(adj_store, s, inv_row, inv_col, wcat_bf16, tm, tk):
    n_pad = adj_store.shape[0]
    hid_pad = s.shape[1]
    cout_pad = wcat_bf16.shape[1]
    flops = 2 * n_pad * n_pad * hid_pad + 2 * n_pad * hid_pad * cout_pad
    bytes_acc = (n_pad * n_pad * adj_store.dtype.itemsize   # A streamed once
                 + n_pad * hid_pad * 4                      # S read once (resident)
                 + n_pad * cout_pad * 4                     # T written once
                 + 2 * hid_pad * cout_pad                   # Wcat
                 + 8 * n_pad)                               # degree vectors
    return pl.pallas_call(
        _prop_mid_kernel,
        grid=(n_pad // tm, n_pad // tk),
        in_specs=[pl.BlockSpec((tm, tk), lambda i, k: (i, k)),
                  pl.BlockSpec((n_pad, hid_pad), lambda i, k: (0, 0)),  # resident S
                  pl.BlockSpec((tm, 1), lambda i, k: (i, 0)),
                  pl.BlockSpec((tm, 1), lambda i, k: (i, 0)),
                  pl.BlockSpec((hid_pad, cout_pad), lambda i, k: (0, 0))],
        out_specs=pl.BlockSpec((tm, cout_pad), lambda i, k: (i, 0)),
        out_shape=jax.ShapeDtypeStruct((n_pad, cout_pad), jnp.float32),
        scratch_shapes=[pltpu.VMEM((tm, hid_pad), jnp.float32)],
        compiler_params=pltpu.CompilerParams(
            dimension_semantics=("parallel", "arbitrary"),
            vmem_limit_bytes=_VMEM_LIMIT),
        cost_estimate=pl.CostEstimate(flops=flops, transcendentals=0,
                                      bytes_accessed=bytes_acc),
    )(adj_store, s, inv_row, inv_col, wcat_bf16)


def _propagate_out(adj_store, t, inv_row, tm, tk):
    n_pad = adj_store.shape[0]
    cout_pad = t.shape[1]
    flops = 2 * n_pad * n_pad * cout_pad
    bytes_acc = (n_pad * n_pad * adj_store.dtype.itemsize   # A streamed once
                 + n_pad * cout_pad * 4                     # T read once (resident)
                 + n_pad * cout_pad * 4                     # Z written once
                 + 4 * n_pad)
    return pl.pallas_call(
        _prop_out_kernel,
        grid=(n_pad // tm, n_pad // tk),
        in_specs=[pl.BlockSpec((tm, tk), lambda i, k: (i, k)),
                  pl.BlockSpec((n_pad, cout_pad), lambda i, k: (0, 0)),  # resident T
                  pl.BlockSpec((tm, 1), lambda i, k: (i, 0))],
        out_specs=pl.BlockSpec((tm, cout_pad), lambda i, k: (i, 0)),
        out_shape=jax.ShapeDtypeStruct((n_pad, cout_pad), jnp.float32),
        scratch_shapes=[pltpu.VMEM((tm, cout_pad), jnp.float32)],
        compiler_params=pltpu.CompilerParams(
            dimension_semantics=("parallel", "arbitrary"),
            vmem_limit_bytes=_VMEM_LIMIT),
        cost_estimate=pl.CostEstimate(flops=flops, transcendentals=0,
                                      bytes_accessed=bytes_acc),
    )(adj_store, t, inv_row)


def gcn_encode(adj, x, w1_pad, wcat_pad, out_dim):
    """Full normalized GCN encoder: (z_mean, z_log_std) for all nodes of adj."""
    n = x.shape[0]
    f_pad = w1_pad.shape[0]
    tm, tk, n_pad = _choose_tiles(n)

    # Degree scalings (cheap XLA prologue, O(N^2) read once).
    # TODO(synk): `anormalize` is external to the reference source; symmetric
    # D^-1/2 A D^-1/2 with inv_sqrt(0) = 0 is assumed.
    adj_f = adj.astype(jnp.float32)
    deg_row = jnp.sum(adj_f, axis=1)
    deg_col = jnp.sum(adj_f, axis=0)
    inv_row = jnp.where(deg_row > 0,
                        jax.lax.rsqrt(jnp.maximum(deg_row, 1e-12)), 0.0)
    inv_col = jnp.where(deg_col > 0,
                        jax.lax.rsqrt(jnp.maximum(deg_col, 1e-12)), 0.0)
    inv_row = _pad2(inv_row[:, None], n_pad, 1)
    inv_col = _pad2(inv_col[:, None], n_pad, 1)

    adj_store = _adj_storage(_pad2(adj_f, n_pad, n_pad))
    x_p = _pad2(x.astype(jnp.float32), n_pad, f_pad).astype(jnp.bfloat16)

    # Pass 1: S = (inv_col * X) @ W1
    s = _transform(x_p, inv_col, w1_pad, tm)
    # Pass 2: T = (inv_col * relu(inv_row * (A @ S))) @ [Wm | Ws]
    t = _propagate_mid(adj_store, s, inv_row, inv_col, wcat_pad, tm, tk)
    # Pass 3: Z = inv_row * (A @ T)
    z = _propagate_out(adj_store, t, inv_row, tm, tk)

    zm = z[:n, :out_dim]
    zls = z[:n, out_dim:2 * out_dim]
    return zm, zls


def identity_encode(x_new, w1_pad, wcat_pad, out_dim):
    """Eval new-node branch (adj == I): skip the adjacency matmuls entirely."""
    n = x_new.shape[0]
    f_pad = w1_pad.shape[0]
    cout_pad = wcat_pad.shape[1]
    n_pad = _round_up(max(n, 16), 16)          # bf16 sublane packing
    if n_pad > _TM_DEFAULT:
        n_pad = _round_up(n_pad, _TM_DEFAULT)
        tm = _TM_DEFAULT
    else:
        tm = n_pad
    x_p = _pad2(x_new.astype(jnp.float32), n_pad, f_pad).astype(jnp.bfloat16)

    z = pl.pallas_call(
        _identity_encode_kernel,
        grid=(n_pad // tm,),
        in_specs=[pl.BlockSpec((tm, f_pad), lambda i: (i, 0)),
                  pl.BlockSpec(w1_pad.shape, lambda i: (0, 0)),
                  pl.BlockSpec(wcat_pad.shape, lambda i: (0, 0))],
        out_specs=pl.BlockSpec((tm, cout_pad), lambda i: (i, 0)),
        out_shape=jax.ShapeDtypeStruct((n_pad, cout_pad), jnp.float32),
        compiler_params=pltpu.CompilerParams(
            dimension_semantics=("parallel",),
            vmem_limit_bytes=_VMEM_LIMIT),
    )(x_p, w1_pad, wcat_pad)
    return z[:n, :out_dim], z[:n, out_dim:2 * out_dim]


# ----------------------------------------------------------------------------
# Module wrapper (parameter init + branch logic = glue, compute = kernels).
# ----------------------------------------------------------------------------
def _xavier_uniform(key, fan_in, fan_out):
    bound = math.sqrt(6.0 / (fan_in + fan_out))
    return jax.random.uniform(key, (fan_in, fan_out), jnp.float32,
                              minval=-bound, maxval=bound)


class RecurHGCAdd:
    """JAX/Pallas port of recurHGC_add (bias=False GraphConvolution layers)."""

    def __init__(self, features_dim, hidden_dim, out_dim, key, random_add=False):
        k1, k2, k3 = jax.random.split(key, 3)
        w1 = _xavier_uniform(k1, features_dim, hidden_dim)    # gc1
        wm = _xavier_uniform(k2, hidden_dim, out_dim)         # gc_mean
        ws = _xavier_uniform(k3, hidden_dim, out_dim)         # gc_log_std
        self.hidden_dim = hidden_dim
        self.out_dim = out_dim
        self.random_add = random_add

        # Lane-pad weights once (minimal 128-multiples) and keep bf16 MXU copies.
        f_pad = _round_up(features_dim, 128)
        h_pad = _round_up(hidden_dim, 128)
        c_pad = _round_up(2 * out_dim, 128)
        self.w1_pad = _pad2(w1, f_pad, h_pad).astype(jnp.bfloat16)
        wcat = jnp.zeros((h_pad, c_pad), jnp.float32)
        wcat = wcat.at[:hidden_dim, :out_dim].set(wm)
        wcat = wcat.at[:hidden_dim, out_dim:2 * out_dim].set(ws)
        self.wcat_pad = wcat.astype(jnp.bfloat16)

    def __call__(self, adj, x, x_new=None, training=False):
        # TODO(synk): train-mode dropout (F.dropout) is a stochastic torch-RNG
        # op and is not reproduced; eval-mode dropout is the identity.
        if x_new is None:
            return gcn_encode(adj, x, self.w1_pad, self.wcat_pad, self.out_dim)

        n_old = x.shape[0]
        if training:
            # TODO(synk): random_add Bernoulli edge sampling is a stochastic
            # torch-RNG op and is not reproduced.
            n_tot = n_old + x_new.shape[0]
            adj_new = jnp.eye(n_tot, dtype=jnp.float32)
            adj_new = adj_new.at[:n_old, :n_old].set(adj.astype(jnp.float32))
            x_all = jnp.concatenate([x, x_new], axis=0)
            zm, zls = gcn_encode(adj_new, x_all, self.w1_pad, self.wcat_pad,
                                 self.out_dim)
            return (zm[:n_old, :], zls[:n_old, :],
                    zm[n_old:, :], zls[n_old:, :])

        # Eval branch: old nodes use the normalized adjacency; new nodes use a
        # raw identity adjacency -> adjacency matmuls are a no-op and bypassed.
        zm_o, zls_o = gcn_encode(adj, x, self.w1_pad, self.wcat_pad, self.out_dim)
        zm_n, zls_n = identity_encode(x_new, self.w1_pad, self.wcat_pad,
                                      self.out_dim)
        return zm_o, zls_o, zm_n, zls_n


# ----------------------------------------------------------------------------
# Pure-JAX reference (same bf16-rounded weights, f32 math) for a sanity check.
# ----------------------------------------------------------------------------
def _reference_encode(adj, x, w1_pad, wcat_pad, features, hidden, out_dim):
    w1 = w1_pad.astype(jnp.float32)[:features, :hidden]
    wm = wcat_pad.astype(jnp.float32)[:hidden, :out_dim]
    ws = wcat_pad.astype(jnp.float32)[:hidden, out_dim:2 * out_dim]
    adj = adj.astype(jnp.float32)
    deg_r = jnp.sum(adj, axis=1)
    deg_c = jnp.sum(adj, axis=0)
    ir = jnp.where(deg_r > 0, jax.lax.rsqrt(jnp.maximum(deg_r, 1e-12)), 0.0)
    ic = jnp.where(deg_c > 0, jax.lax.rsqrt(jnp.maximum(deg_c, 1e-12)), 0.0)
    an = ir[:, None] * adj * ic[None, :]
    h = jnp.maximum(an @ (x @ w1), 0.0)
    return an @ (h @ wm), an @ (h @ ws)


# ----------------------------------------------------------------------------
# Demo / smoke test.
# ----------------------------------------------------------------------------
if __name__ == "__main__":
    key = jax.random.PRNGKey(0)
    k_adj, k_x, k_xn, k_params = jax.random.split(key, 4)

    N_OLD, N_NEW = 16, 4
    FEATURES, HIDDEN, OUT = 16, 32, 8

    # Symmetric 0/1 adjacency with self-loops (so degrees are > 0).
    a = (jax.random.uniform(k_adj, (N_OLD, N_OLD)) < 0.3).astype(jnp.float32)
    adj = jnp.clip(a + a.T + jnp.eye(N_OLD, dtype=jnp.float32), 0.0, 1.0)

    x = jax.random.normal(k_x, (N_OLD, FEATURES), jnp.float32)
    x_new = jax.random.normal(k_xn, (N_NEW, FEATURES), jnp.float32)

    model = RecurHGCAdd(FEATURES, HIDDEN, OUT, k_params)

    # Branch 1: input_new is None -> (z_mean, z_log_std)
    z_mean, z_log_std = model(adj, x)
    jax.block_until_ready((z_mean, z_log_std))
    assert z_mean.shape == (N_OLD, OUT) and z_log_std.shape == (N_OLD, OUT)
    assert bool(jnp.all(jnp.isfinite(z_mean))) and bool(jnp.all(jnp.isfinite(z_log_std)))

    # Loose numerical check vs a pure-JAX f32 reference (bf16 MXU operands
    # inside the kernels give ~1e-2 relative error).
    zm_ref, zls_ref = _reference_encode(adj, x, model.w1_pad, model.wcat_pad,
                                        FEATURES, HIDDEN, OUT)
    scale = float(jnp.max(jnp.abs(zm_ref))) + 1e-6
    assert float(jnp.max(jnp.abs(z_mean - zm_ref))) < 0.1 * scale
    scale = float(jnp.max(jnp.abs(zls_ref))) + 1e-6
    assert float(jnp.max(jnp.abs(z_log_std - zls_ref))) < 0.1 * scale

    # Branch 2: eval with new nodes -> old/new mean & log_std
    zm_o, zls_o, zm_n, zls_n = model(adj, x, x_new, training=False)
    jax.block_until_ready((zm_o, zls_o, zm_n, zls_n))
    assert zm_o.shape == (N_OLD, OUT) and zm_n.shape == (N_NEW, OUT)
    assert bool(jnp.all(jnp.isfinite(zm_n))) and bool(jnp.all(jnp.isfinite(zls_n)))

    # Branch 3: training with new nodes (deterministic part)
    zm_o2, zls_o2, zm_n2, zls_n2 = model(adj, x, x_new, training=True)
    jax.block_until_ready((zm_o2, zls_o2, zm_n2, zls_n2))
    assert zm_o2.shape == (N_OLD, OUT) and zm_n2.shape == (N_NEW, OUT)

    print("KERNEL_OK")
</pallas_src>

<mosaic_0001>
module attributes {stable_mosaic.version = 11 : i64} {
  func.func @_transform_kernel(%arg0: i32, %arg1: memref<64x1xf32, #tpu.memory_space<vmem>>, %arg2: memref<64x128xbf16, #tpu.memory_space<vmem>>, %arg3: memref<128x128xbf16, #tpu.memory_space<vmem>>, %arg4: memref<64x128xf32, #tpu.memory_space<vmem>>) attributes {dimension_semantics = [#tpu.dimension_semantics<parallel>], iteration_bounds = array<i64: 2>, scalar_prefetch = 0 : i64, scratch_operands = 0 : i64, tpu.core_type = #tpu.core_type<tc>, window_params = [{transform_indices = @transform_0, window_bounds = array<i64: 64, 1>}, {transform_indices = @transform_1, window_bounds = array<i64: 64, 128>}, {pipeline_mode = #tpu.pipeline_mode<synchronous>, transform_indices = @transform_2, window_bounds = array<i64: 128, 128>}, {transform_indices = @transform_3, window_bounds = array<i64: 64, 128>}]} {
    %c0 = arith.constant 0 : index
    %c0_0 = arith.constant 0 : index
    %0 = vector.load %arg2[%c0, %c0_0] : memref<64x128xbf16, #tpu.memory_space<vmem>>, vector<64x128xbf16>
    %1 = arith.extf %0 : vector<64x128xbf16> to vector<64x128xf32>
    %c0_1 = arith.constant 0 : index
    %c0_2 = arith.constant 0 : index
    %2 = vector.load %arg1[%c0_1, %c0_2] : memref<64x1xf32, #tpu.memory_space<vmem>>, vector<64x1xf32>
    %3 = vector.broadcast %2 : vector<64x1xf32> to vector<64x128xf32>
    %4 = arith.mulf %1, %3 : vector<64x128xf32>
    %5 = arith.truncf %4 : vector<64x128xf32> to vector<64x128xbf16>
    %c0_3 = arith.constant 0 : index
    %c0_4 = arith.constant 0 : index
    %6 = vector.load %arg3[%c0_3, %c0_4] : memref<128x128xbf16, #tpu.memory_space<vmem>>, vector<128x128xbf16>
    %cst = arith.constant dense<0.000000e+00> : vector<64x128xf32>
    %7 = tpu.matmul %5, %6, %cst {dimension_numbers = #tpu.dot_dimension_numbers<[1], [0], [0], [1], [0, 0, 1, 1], [], []>} : vector<64x128xbf16>, vector<128x128xbf16>, vector<64x128xf32> -> vector<64x128xf32>
    %c0_5 = arith.constant 0 : index
    %c0_6 = arith.constant 0 : index
    %8 = vector.load %arg4[%c0_5, %c0_6] : memref<64x128xf32, #tpu.memory_space<vmem>>, vector<64x128xf32>
    tpu.vector_store %arg4[%c0_5, %c0_6], %7 {strides = array<i32>} : memref<64x128xf32, #tpu.memory_space<vmem>>, vector<64x128xf32>,
    return
  }
  func.func @transform_0(%arg0: i32) -> (i32, i32) {
    %c0_i32 = arith.constant 0 : i32
    %c0_i32_0 = arith.constant 0 : i32
    return %arg0, %c0_i32 : i32, i32
  }
  func.func @transform_1(%arg0: i32) -> (i32, i32) {
    %c0_i32 = arith.constant 0 : i32
    %c0_i32_0 = arith.constant 0 : i32
    return %arg0, %c0_i32 : i32, i32
  }
  func.func @transform_2(%arg0: i32) -> (i32, i32) {
    %c0_i32 = arith.constant 0 : i32
    %c0_i32_0 = arith.constant 0 : i32
    %c0_i32_1 = arith.constant 0 : i32
    return %c0_i32, %c0_i32_0 : i32, i32
  }
  func.func @transform_3(%arg0: i32) -> (i32, i32) {
    %c0_i32 = arith.constant 0 : i32
    %c0_i32_0 = arith.constant 0 : i32
    return %arg0, %c0_i32 : i32, i32
  }
}

</mosaic_0001>

<bundles_post_ra>
// kernel: tpu_custom_call.1
= control target key start
LH: loop header
LB: loop body
LE: loop exit
PB: predicated region body
PF: predicated region fallthrough
CT: control target
= control target key end

     0   :  { %8 = vsyncpa [#allocation3], 0  ;;  %s816_s0 = inlined_call_operand.vmem [shape: f32[128,1], index: 0, kind: input, shape index: {}]   ;;  %s817_s1 = inlined_call_operand.vmem [shape: bf16[128,128], index: 1, kind: input, shape index: {}]   ;;  %s818_s2 = inlined_call_operand.vmem [shape: bf16[128,128], index: 2, kind: input, shape index: {}]   ;;  %s819_s3 = inlined_call_operand.hbm [shape: f32[128,128], index: 3, kind: output, shape index: {}]  }
   0x1   :  { %10 = vsyncpa [#allocation3 + $0x1], 0  ;;  %s691_s12 = smov 0   ;;  %s693_s13 = smov 0  }
   0x2   :  { %s695_s14 = smov 0   ;;  %s697_s15 = smov 0  }
   0x3 LB: > { %s712_s16 = sadd.s32 4294967295, %s666_s15   ;;  %s461_s17 = sadd.s32 4294967294, %s666_s15   ;;  %s666_s15 = sphi %s697_s15, %s825_s15   ;;  %s662_s14 = sphi %s695_s14, %s824_s14   ;;  %s658_s13 = sphi %s693_s13, %s823_s13   ;;  %s654_s12 = sphi %s691_s12, %s822_s12  }
   0x4   : > { %s716_s18 = sadd.s32 1, %s666_s15   ;;  %s96_s19 = sadd.s32 1, %s662_s14 }
   0x5   : > { %s93_s20 = ssub.s32 %s666_s15, %s716_s18  ;;  %p106_p0 = scmp.ne.s32.totalorder %s662_s14, %s658_s13 }
   0x6   : > { %p94_p1 = scmp.eq.s32.totalorder %s93_s20, 0  ;;  %p107_p2 = scmp.eq.s32.totalorder %s712_s16, 1 }
   0x7   : > { %p112_p3 = scmp.ne.s32.totalorder %s658_s13, %s654_s12  ;;  %p113_p4 = scmp.eq.s32.totalorder %s461_s17, 1 }
   0x8   : > { %s727_s21 = scalar_select %p94_p1, %s662_s14, %s96_s19  }
   0x9   : > { %p729_p5 = por %p107_p2, %p106_p0  ;;  %p733_p6 = por %p113_p4, %p112_p3 }
   0xa   : > { %p464_p7 = scmp.ge.s32.totalorder %s666_s15, 1  ;;  %p152_p8 = scmp.lt.s32.totalorder %s666_s15, 3 }
   0xc   : > { %p153_p9 = pnand %p464_p7, %p152_p8 }
   0xd   : > { %s466_s24 = sshll.u32 (!%p153_p9), %s712_s16, 3  ;;  %s515_s7 = sshll.u32 (!%p153_p9), %s712_s16, 6 }
   0xe   : > { %156 = sbr.rel (%p153_p9) target bundleno = 297 (0x129), region = 32  ;;  %p182_p10 = scmp.lt.s32.totalorder (!%p153_p9), %s466_s24, 15 }
   0xf   : > { %s383_s10 = scalar_lea.hbm (!%p153_p9), %s819_s3, %s515_s7  ;;  %s624_s27 = scalar_lea.hbm (!%p153_p9), %s819_s3, 128 }
  0x10   : > { %s386_s17 = sshll.u32 (!%p153_p9), %s383_s10, 4  ;;  %s387_s17 = int_to_ptr.hbm [resolvable:$true] %s386_s17 }
  0x11   : > { %s618_s19 = sshra.s32 (!%p153_p9), %s387_s17, 4  ;;  %s619_s19 = int_to_ptr.hbm [resolvable:$true] %s618_s19 }
  0x12   : > { %s620_s20 = scalar_lea.hbm (!%p153_p9), %s619_s19, 64  ;;  %p625_p0 = scmp.lt.s32.totalorder (!%p153_p9), %s619_s19, %s819_s3 }
  0x13   : > { %v514_v0 = vld [vmem:[%s818_s2 + $0x38] sm:$0xff]  ;;  %v668_v1 = vmov 0   ;;  %v513_v2 = vld [vmem:[%s818_s2 + $0x30] sm:$0xff]  ;;  %s827_s24 = smov (!%p182_p10, %s466_s24), 15  ;;  %v512_v3 = vld [vmem:[%s818_s2 + $0x28] sm:$0xff]  ;;  %p621_p11 = scmp.ne.s32.totalorder %s619_s19, %s620_s20 }
  0x14   : > { %602 = vset.pattern.permute.xlu1 %v668_v1  ;;  %601 = vset.pattern.permute.xlu0 %v668_v1  ;;  %s467_s29 = sshll.u32 %s827_s24, 3  ;;  %v511_v7 = vld [vmem:[%s818_s2 + $0x20] sm:$0xff]  ;;  %v510_v10 = vld [vmem:[%s818_s2 + $0x18] sm:$0xff]  ;;  %v509_v14 = vld [vmem:[%s818_s2 + $0x10] sm:$0xff]  ;;  %s469_s28 = sshll.u32 %s827_s24, 2 }
  0x15   : > { %603 = vset.pattern.permute.xlu2 %v668_v1  ;;  %334 = vmatpush.bf16.msra.mxu0 %v514_v0  ;;  %s752_s5 = scalar_lea.vmem %s816_s0, %s467_s29  ;;  %v508_v15 = vld [vmem:[%s818_s2 + $0x8] sm:$0xff]  ;;  %v507_v16 = vld [vmem:[%s818_s2] sm:$0xff]  ;;  %s191_s4 = scalar_lea.vmem %s817_s1, %s469_s28 }
  0x16   : > { %536 = vmatpush.bf16.msra.mxu2 %v514_v0  ;;  %537 = vmatpush.bf16.msra.mxu3 %v514_v0  ;;  %v216_v4 = vld [vmem:[%s752_s5 + $0x30] sm:$0xff]  ;;  %v214_v5 = vld [vmem:[%s752_s5 + $0x20] sm:$0xff]  ;;  %v217_v8 = vld [vmem:[%s752_s5 + $0x38] sm:$0xff]  ;;  %s178_s24 = sand.u32 1, %s658_s13   ;;  %p622_p12 = pnand %p621_p11, %p729_p5 }
  0x17   : > { %535 = vmatpush.bf16.msra.mxu1 %v514_v0  ;;  %250 = vperm.xlu1 %602, %v216_v4   ;;  %v210_v6 = vld [vmem:[%s752_s5] sm:$0xff]  ;;  %v215_v9 = vld [vmem:[%s752_s5 + $0x28] sm:$0xff]  ;;  %v213_v12 = vld [vmem:[%s752_s5 + $0x18] sm:$0xff]  ;;  %s372_s16 = scalar_lea.sflag [#allocation3], %s178_s24  ;;  %p626_p1 = scmp.lt.s32.totalorder %s624_s27, %s620_s20 }
  0x18   : > { %240 = vperm.xlu0 %601, %v214_v5   ;;  %220 = vperm.xlu2 %603, %v210_v6   ;;  %v211_v11 = vld [vmem:[%s752_s5 + $0x8] sm:$0xff]  ;;  %v212_v13 = vld [vmem:[%s752_s5 + $0x10] sm:$0xff]  ;;  %v517_v17 = vld [vmem:[%s191_s4] sm:$0xff]   ;;  %s465_s5 = sshll.u32 %s178_s24, 6  ;;  %p623_p13 = pneg %p622_p12 }
  0x19   : > { %335 = vmatpush.bf16.msra.mxu0 %v513_v2  ;;  %v518_v19 = vunpack.c.l.bf16 %v517_v17  ;;  %v519_v20 = vunpack.c.h.bf16 %v517_v17  ;;  %v534_v27 = vld [vmem:[%s191_s4 + $0x18] sm:$0xff]   ;;  %v533_v28 = vld [vmem:[%s191_s4 + $0x10] sm:$0xff]   ;;  %v532_v39 = vld [vmem:[%s191_s4 + $0x8] sm:$0xff]   ;;  %s180_s6 = scalar_lea.vmem [#allocation2], %s465_s5  ;;  %p627_p2 = por %p626_p1, %p625_p0 }
  0x1a   : > { %539 = vmatpush.bf16.msra.mxu2 %v513_v2  ;;  %540 = vmatpush.bf16.msra.mxu3 %v513_v2  ;;  %v530_v29 = vunpack.c.l.bf16 %v534_v27  ;;  %v526_v30 = vunpack.c.l.bf16 %v533_v28  ;;  %v531_v31 = vunpack.c.h.bf16 %v534_v27  ;;  %v527_v32 = vunpack.c.h.bf16 %v533_v28  ;;  %s384_s11 = sshll.u32 %s180_s6, 4  ;;  %s385_s11 = int_to_ptr.vmem [resolvable:$true] %s384_s11 }
  0x1b   : > { %538 = vmatpush.bf16.msra.mxu1 %v513_v2  ;;  %v523_v42 = vunpack.c.h.bf16 %v532_v39  ;;  %v522_v43 = vunpack.c.l.bf16 %v532_v39  ;;  %p628_p3 = pnand %p627_p2, %p623_p13 }
  0x1d   : > { %336 = vmatpush.bf16.msra.mxu0 %v512_v3 }
  0x1e   : > { %542 = vmatpush.bf16.msra.mxu2 %v512_v3  ;;  %543 = vmatpush.bf16.msra.mxu3 %v512_v3 }
  0x1f   : > { %541 = vmatpush.bf16.msra.mxu1 %v512_v3  ;;  %255 = vperm.xlu1 %602, %v217_v8  }
  0x20   : > { %245 = vperm.xlu0 %601, %v215_v9   ;;  %225 = vperm.xlu2 %603, %v211_v11  }
  0x21   : > { %337 = vmatpush.bf16.msra.mxu0 %v511_v7 }
  0x22   : > { %545 = vmatpush.bf16.msra.mxu2 %v511_v7  ;;  %546 = vmatpush.bf16.msra.mxu3 %v511_v7 }
  0x23   : > { %544 = vmatpush.bf16.msra.mxu1 %v511_v7 }
  0x25   : > { %338 = vmatpush.bf16.msra.mxu0 %v510_v10 }
  0x26   : > { %548 = vmatpush.bf16.msra.mxu2 %v510_v10  ;;  %549 = vmatpush.bf16.msra.mxu3 %v510_v10 }
  0x27   : > { %547 = vmatpush.bf16.msra.mxu1 %v510_v10  ;;  %235 = vperm.xlu1 %602, %v213_v12  }
  0x28   : > { %230 = vperm.xlu0 %601, %v212_v13  }
  0x29   : > { %339 = vmatpush.bf16.msra.mxu0 %v509_v14 }
  0x2a   : > { %551 = vmatpush.bf16.msra.mxu2 %v509_v14  ;;  %552 = vmatpush.bf16.msra.mxu3 %v509_v14 }
  0x2b   : > { %550 = vmatpush.bf16.msra.mxu1 %v509_v14 }
  0x2d   : > { %340 = vmatpush.bf16.msra.mxu0 %v508_v15 }
  0x2e   : > { %554 = vmatpush.bf16.msra.mxu2 %v508_v15  ;;  %555 = vmatpush.bf16.msra.mxu3 %v508_v15 }
  0x2f   : > { %553 = vmatpush.bf16.msra.mxu1 %v508_v15 }
  0x31   : > { %341 = vmatpush.bf16.msra.mxu0 %v507_v16 }
  0x32   : > { %557 = vmatpush.bf16.msra.mxu2 %v507_v16  ;;  %558 = vmatpush.bf16.msra.mxu3 %v507_v16 }
  0x33   : > { %556 = vmatpush.bf16.msra.mxu1 %v507_v16 }
  0x72   : > { %v221_v18 = vpop.permute.xlu2 %220 }
  0x73   : > { %v258_v21 = vmul.f32 %v518_v19, %v221_v18 }
  0x7a   : > { %v226_v22 = vpop.permute.xlu2 %225 }
  0x7b   : > { %v259_v23 = vmul.f32 %v519_v20, %v226_v22 }
  0x7d   : > { %v266_v24 = vpack.c.bf16 %v259_v23, %v258_v21 }
  0x7f   : > { %342 = vmatmul.bf16.vlgmr.msra.gmra.mxu0 %v266_v24 }
  0x89   : > { %v251_v25 = vpop.permute.xlu1 %250 }
  0x8a   : > { %v241_v26 = vpop.permute.xlu0 %240  ;;  %v264_v35 = vmul.f32 %v530_v29, %v251_v25 }
  0x8b   : > { %v262_v36 = vmul.f32 %v526_v30, %v241_v26 }
  0x91   : > { %v256_v33 = vpop.permute.xlu1 %255 }
  0x92   : > { %v246_v34 = vpop.permute.xlu0 %245  ;;  %v265_v37 = vmul.f32 %v531_v31, %v256_v33 }
  0x93   : > { %v263_v38 = vmul.f32 %v527_v32, %v246_v34 }
  0x94   : > { %v269_v41 = vpack.c.bf16 %v265_v37, %v264_v35 }
  0x95   : > { %v268_v40 = vpack.c.bf16 %v263_v38, %v262_v36 }
  0x96   : > { %357 = vmatmul.bf16.vlgmr.msra.gmra.mxu3 %v269_v41 }
  0x97   : > { %352 = vmatmul.bf16.vlgmr.msra.gmra.mxu2 %v268_v40 }
  0x99   : > { %v236_v44 = vpop.permute.xlu1 %235 }
  0x9a   : > { %v231_v45 = vpop.permute.xlu0 %230  ;;  %v261_v46 = vmul.f32 %v523_v42, %v236_v44 }
  0x9b   : > { %v260_v47 = vmul.f32 %v522_v43, %v231_v45 }
  0x9d   : > { %v267_v48 = vpack.c.bf16 %v261_v46, %v260_v47 }
  0x9f   : > { %347 = vmatmul.bf16.vlgmr.msra.gmra.mxu1 %v267_v48 }
  0xfc   : > { %v343_v49 = vpop.f32.mrf.mxu0 }
  0xfd   : > { %363 = vst [vmem:[%s180_s6] sm:$0xff] %v343_v49 }
 0x104   : > { %v345_v50 = vpop.f32.mrf.mxu0 }
 0x105   : > { %364 = vst [vmem:[%s180_s6 + $0x8] sm:$0xff] %v345_v50 }
 0x119   : > { %v358_v52 = vpop.f32.mrf.mxu3 }
 0x11a   : > { %v353_v51 = vpop.f32.mrf.mxu2  ;;  %369 = vst [vmem:[%s180_s6 + $0x30] sm:$0xff] %v358_v52 }
 0x11b   : > { %367 = vst [vmem:[%s180_s6 + $0x20] sm:$0xff] %v353_v51 }
 0x11c   : > { %v348_v53 = vpop.f32.mrf.mxu1 }
 0x11d   : > { %365 = vst [vmem:[%s180_s6 + $0x10] sm:$0xff] %v348_v53 }
 0x121   : > { %v360_v55 = vpop.f32.mrf.mxu3 }
 0x122   : > { %v355_v54 = vpop.f32.mrf.mxu2  ;;  %370 = vst [vmem:[%s180_s6 + $0x38] sm:$0xff] %v360_v55 }
 0x123   : > { %368 = vst [vmem:[%s180_s6 + $0x28] sm:$0xff] %v355_v54 }
 0x124   : > { %v350_v56 = vpop.f32.mrf.mxu1 }
 0x125   : > { %366 = vst [vmem:[%s180_s6 + $0x18] sm:$0xff] %v350_v56 }
 0x126   : > { %631 = shalt.err (!%p628_p3)
}
 0x127   : > { %s669_s30 = smov 128   ;;  %s670_s4 = smov 8  }
 0x128   : > { %559 = dma.vmem_to_hbm [thread:$0]  (%p729_p5), %s385_s11, 1024, %s387_s17, %s372_s16, %s669_s30, %s669_s30, %s670_s4  }
 0x129 PF: > { %p565_p4 = scmp.ge.s32.totalorder %s666_s15, 2  ;;  %s401_s24 = sand.u32 1, %s654_s12  }
 0x12a   : > { %s402_s5 = scalar_lea.sflag [#allocation3], %s401_s24 }
 0x12b   : > { %p562_p7 = pnand %p565_p4, %p733_p6 }
 0x12d   : > { %p563_p8 = pneg %p562_p7 }
 0x12f   : > { %649 = dma.done.wait (%p563_p8), %s402_s5, 1024  }
 0x130   : > { %651 = vsyncadd (%p563_p8), %s402_s5, 4294966272  ;;  %p13_p9 = scmp.ge.s32.totalorder %s716_s18, 4   ;;  %s822_s12 = smov %s658_s13 }
 0x131   : > { %s823_s13 = smov %s662_s14  ;;  %s824_s14 = smov %s727_s21 }
 0x132   : > { %s825_s15 = smov %s716_s18  ;;  %15 = sbr.rel (!%p13_p9) target bundleno = 3 (0x3), region = 70 }
 0x137   :  { %408 = vsyncpa [#allocation3], 1 }
 0x138   :  { %410 = vsyncpa [#allocation3 + $0x1], 1 }

</bundles_post_ra>
